<compile_context>
chip_gen: v6e
topology: v6e:2x2x1
jax: 0.10.0
libtpu: 0.0.40
codegen_flags: <defaults>
</compile_context>

<pallas_src>
import functools
import math

import jax
import jax.numpy as jnp
from jax.experimental import pallas as pl
from jax.experimental.pallas import tpu as pltpu


LANE = 128                           # vreg lane width
MAX_LANE_WIDTH = 2048                # cap on slab last-dim width
TILE_BYTES_TARGET = 2 * 1024 * 1024  # per-buffer tile target (1-4 MiB sweet spot)
DEFAULT_VMEM_CAP = 64 * 1024 * 1024  # v7x per-TC VMEM (most conservative gen)
MIN_KERNEL_ELEMS = LANE * 8          # below this, plain fused XLA is strictly better


def _cdiv(a, b):
    return -(-a // b)


def _vmem_capacity_bytes():
    try:
        return int(pltpu.get_tpu_info().vmem_capacity_bytes)
    except Exception:
        return DEFAULT_VMEM_CAP


def _sublane_granularity(min_itemsize):
    """Native sublane packing: 8 rows/vreg for 4-byte, 16 for 2-byte, 32 for 1-byte."""
    if min_itemsize >= 4:
        return 8
    if min_itemsize == 2:
        return 16
    return 32


def _pick_lane_width(n, sub):
    """Widest multiple-of-128 divisor of n (<= MAX_LANE_WIDTH).

    Prefers a width that leaves >= 4*sub rows (room for a deep grid), then
    >= sub rows, then any divisor.  Returns 0 if n has no multiple-of-128
    factor (caller falls back to plain XLA -- no pad/slice passes).
    """
    def best_leq(limit):
        w = min(MAX_LANE_WIDTH, (limit // LANE) * LANE)
        while w >= LANE:
            if n % w == 0:
                return w
            w -= LANE
        return 0

    for min_rows in (4 * sub, sub, 1):
        if n >= min_rows * LANE:
            w = best_leq(n // min_rows)
            if w:
                return w
    return 0


def _pick_row_tile(rows, lane_w, itemsize, sub, n_bufs):
    """Row tile: multiple of `sub`, ~<=2 MiB per buffer, >=4 grid steps when possible,
    even step count preferred (v7x megacore)."""
    vmem_cap = _vmem_capacity_bytes()
    # Never claim more than ~a quarter of VMEM across all double-buffered tiles.
    per_buf = min(TILE_BYTES_TARGET,
                  max(lane_w * sub * itemsize, (vmem_cap // 4) // (2 * n_bufs)))
    budget_rows = max(sub, (per_buf // (lane_w * itemsize)) // sub * sub)

    if rows >= 4 * sub:
        steps = 4
    elif rows >= 2 * sub:
        steps = 2
    else:
        steps = 1
    tile = max(sub, ((rows // steps) // sub) * sub)
    tile = min(tile, budget_rows)

    # Prefer an even number of grid steps so both v7x TensorCores stay busy.
    nblk = _cdiv(rows, tile)
    if nblk > 1 and nblk % 2 == 1 and tile >= 2 * sub:
        half = max(sub, ((tile // 2) // sub) * sub)
        if half < tile and _cdiv(rows, half) % 2 == 0:
            tile = half

    return min(tile, rows)


def _lambda_kernel(*refs, f, n_inputs):
    """Apply the wrapped function `f` elementwise to the current VMEM tiles."""
    in_refs = refs[:n_inputs]
    out_ref = refs[n_inputs]
    vals = []
    for r in in_refs:
        v = r[...]
        # v5e has no bf16 VPU/EUP: do the math in f32 (one upcast, one final
        # round) instead of paying implicit per-op converts.
        if jnp.issubdtype(v.dtype, jnp.floating) and jnp.dtype(v.dtype).itemsize < 4:
            v = v.astype(jnp.float32)
        vals.append(v)
    out_ref[...] = f(*vals).astype(out_ref.dtype)


def pallas_lambda(f, *bound_args, **bound_kwargs):
    """JAX/Pallas equivalent of zenkai.nnz.Lambda(f, *args, **kwargs).

    Returns a callable `g(*x)` computing f(*x, *bound_args, **bound_kwargs).
    Elementwise, shape-preserving f with scalar bound args runs inside a
    Pallas TPU kernel; everything else runs as plain fused XLA.
    """

    def f_bound(*tensors):
        return f(*tensors, *bound_args, **bound_kwargs)

    # Array-valued bound args would be re-broadcast against the internal
    # (rows, W) slab tiles instead of the user-visible shape; keep them on the
    # plain-XLA path.
    bound_leaves = jax.tree_util.tree_leaves((bound_args, bound_kwargs))
    has_array_bound = any(getattr(leaf, "ndim", 0) > 0 for leaf in bound_leaves)

    def forward(*x):
        if len(x) == 0:
            return f_bound()

        shape = tuple(x[0].shape)
        same_shape = all(tuple(xi.shape) == shape for xi in x)

        # TODO(synk): elementwise-ness of f is not verifiable at trace time;
        # only shape preservation is checked.  Reductions / cross-position f
        # that happen to preserve shape are not detected and belong on the
        # plain path.
        pallas_ok = same_shape and not has_array_bound
        out_dtype = None
        if pallas_ok:
            try:
                out_aval = jax.eval_shape(
                    f_bound, *[jax.ShapeDtypeStruct(xi.shape, xi.dtype) for xi in x])
            except Exception:
                out_aval = None
            if (out_aval is not None and hasattr(out_aval, "shape")
                    and hasattr(out_aval, "dtype")
                    and tuple(out_aval.shape) == shape):
                out_dtype = jnp.dtype(out_aval.dtype)
            else:
                pallas_ok = False

        n = int(math.prod(shape))

        if not pallas_ok or n < MIN_KERNEL_ELEMS:
            # TODO(synk): non-elementwise / multi-output f, array-valued bound
            # args, and tiny inputs run as plain fused XLA (single HBM pass).
            return f_bound(*x)

        itemsizes = [jnp.dtype(xi.dtype).itemsize for xi in x] + [out_dtype.itemsize]
        sub = _sublane_granularity(min(itemsizes))
        itemsize_max = max(itemsizes)

        w = _pick_lane_width(n, sub)
        if w == 0:
            # No multiple-of-128 factorization of n: a kernel would need
            # pad/slice (extra full HBM passes); plain fused XLA is one pass.
            return f_bound(*x)

        rows = n // w
        n_bufs = len(x) + 1                      # inputs + output
        row_tile = _pick_row_tile(rows, w, itemsize_max, sub, n_bufs)
        num_blocks = _cdiv(rows, row_tile)       # boundary block masked by Pallas

        slabs = [jnp.reshape(xi, (rows, w)) for xi in x]   # free: contiguous
        spec = pl.BlockSpec((row_tile, w), lambda i: (i, 0))
        kernel = functools.partial(_lambda_kernel, f=f_bound, n_inputs=len(x))

        try:
            cost = pl.estimate_cost(
                f_bound, *[jax.ShapeDtypeStruct((rows, w), xi.dtype) for xi in x])
        except Exception:
            cost = None

        vmem_cap = _vmem_capacity_bytes()
        out_slab = pl.pallas_call(
            kernel,
            out_shape=jax.ShapeDtypeStruct((rows, w), out_dtype),
            grid=(num_blocks,),
            in_specs=[spec] * len(x),
            out_specs=spec,
            compiler_params=pltpu.CompilerParams(
                dimension_semantics=("parallel",),
                vmem_limit_bytes=int(min(vmem_cap * 3 // 4, 64 * 1024 * 1024))),
            cost_estimate=cost,
        )(*slabs)

        return jnp.reshape(out_slab, shape)      # free: contiguous

    return jax.jit(forward)


if __name__ == "__main__":
    # Example wrapped function (what a user would pass to Lambda):
    #   Lambda(lambda x, y, scale: scale * x * sigmoid(x) + y, 2.0)
    def wrapped_fn(x, y, scale):
        return scale * x * jax.nn.sigmoid(x) + y

    lam = pallas_lambda(wrapped_fn, 2.0)     # == Lambda(wrapped_fn, 2.0)

    key = jax.random.PRNGKey(0)
    k1, k2 = jax.random.split(key)

    # NCHW input, matching PyTorch conventions.
    x = jax.random.normal(k1, (2, 4, 16, 16), dtype=jnp.float32)
    y = jax.random.normal(k2, (2, 4, 16, 16), dtype=jnp.float32)
    out = lam(x, y)
    jax.block_until_ready(out)
    ref = wrapped_fn(x, y, 2.0)
    assert out.shape == ref.shape
    assert jnp.allclose(out, ref, atol=1e-5, rtol=1e-5)

    # Multi-step grid path (still small): 2*4*64*64 = 32768 elems -> 4 blocks.
    lam_tanh = pallas_lambda(jnp.tanh)       # == Lambda(torch.tanh)
    z = jax.random.normal(key, (2, 4, 64, 64), dtype=jnp.float32)
    out2 = lam_tanh(z)
    jax.block_until_ready(out2)
    assert jnp.allclose(out2, jnp.tanh(z), atol=1e-5, rtol=1e-5)

    # Boundary-masked (non-divisible rows) path: n = 2304 -> (9, 256) slab,
    # 2 blocks of 8 rows, last block's OOB rows discarded.
    zb = jax.random.normal(k1, (2, 4, 18, 16), dtype=jnp.float32)
    out3 = lam_tanh(zb)
    jax.block_until_ready(out3)
    assert jnp.allclose(out3, jnp.tanh(zb), atol=1e-5, rtol=1e-5)

    # bf16 inputs: in-kernel f32 math, one final round to bf16.
    xb = x.astype(jnp.bfloat16)
    yb = y.astype(jnp.bfloat16)
    outb = lam(xb, yb)
    jax.block_until_ready(outb)
    refb = wrapped_fn(xb.astype(jnp.float32), yb.astype(jnp.float32), 2.0)
    assert outb.dtype == jnp.bfloat16
    assert jnp.allclose(outb.astype(jnp.float32), refb, atol=2e-2, rtol=2e-2)

    # Awkward shape (no multiple-of-128 factor) -> plain fused XLA fallback.
    z2 = jax.random.normal(k2, (3, 5, 7), dtype=jnp.float32)
    out4 = lam_tanh(z2)
    jax.block_until_ready(out4)
    assert jnp.allclose(out4, jnp.tanh(z2), atol=1e-5, rtol=1e-5)

    print("KERNEL_OK")
</pallas_src>

<mosaic_0001>
module attributes {stable_mosaic.version = 11 : i64} {
  func.func @_lambda_kernel(%arg0: i32, %arg1: memref<8x256xf32, #tpu.memory_space<vmem>>, %arg2: memref<8x256xf32, #tpu.memory_space<vmem>>, %arg3: memref<8x256xf32, #tpu.memory_space<vmem>>) attributes {dimension_semantics = [#tpu.dimension_semantics<parallel>], iteration_bounds = array<i64: 1>, scalar_prefetch = 0 : i64, scratch_operands = 0 : i64, tpu.core_type = #tpu.core_type<tc>, window_params = [{transform_indices = @transform_0, window_bounds = array<i64: 8, 256>}, {transform_indices = @transform_1, window_bounds = array<i64: 8, 256>}, {transform_indices = @transform_2, window_bounds = array<i64: 8, 256>}]} {
    %c0 = arith.constant 0 : index
    %c0_0 = arith.constant 0 : index
    %0 = vector.load %arg1[%c0, %c0_0] : memref<8x256xf32, #tpu.memory_space<vmem>>, vector<8x256xf32>
    %c0_1 = arith.constant 0 : index
    %c0_2 = arith.constant 0 : index
    %1 = vector.load %arg2[%c0_1, %c0_2] : memref<8x256xf32, #tpu.memory_space<vmem>>, vector<8x256xf32>
    %cst = arith.constant 2.000000e+00 : f32
    %2 = vector.broadcast %cst : f32 to vector<8x256xf32>
    %3 = arith.mulf %2, %0 : vector<8x256xf32>
    %4 = arith.negf %0 : vector<8x256xf32>
    %5 = math.exp %4 : vector<8x256xf32>
    %cst_3 = arith.constant 1.000000e+00 : f32
    %6 = vector.broadcast %cst_3 : f32 to vector<8x256xf32>
    %7 = arith.addf %6, %5 : vector<8x256xf32>
    %8 = arith.divf %6, %7 : vector<8x256xf32>
    %9 = arith.mulf %3, %8 : vector<8x256xf32>
    %10 = arith.addf %9, %1 : vector<8x256xf32>
    %c0_4 = arith.constant 0 : index
    %c0_5 = arith.constant 0 : index
    %11 = vector.load %arg3[%c0_4, %c0_5] : memref<8x256xf32, #tpu.memory_space<vmem>>, vector<8x256xf32>
    tpu.vector_store %arg3[%c0_4, %c0_5], %10 {strides = array<i32>} : memref<8x256xf32, #tpu.memory_space<vmem>>, vector<8x256xf32>,
    return
  }
  func.func @transform_0(%arg0: i32) -> (i32, i32) {
    %c0_i32 = arith.constant 0 : i32
    %c0_i32_0 = arith.constant 0 : i32
    return %arg0, %c0_i32 : i32, i32
  }
  func.func @transform_1(%arg0: i32) -> (i32, i32) {
    %c0_i32 = arith.constant 0 : i32
    %c0_i32_0 = arith.constant 0 : i32
    return %arg0, %c0_i32 : i32, i32
  }
  func.func @transform_2(%arg0: i32) -> (i32, i32) {
    %c0_i32 = arith.constant 0 : i32
    %c0_i32_0 = arith.constant 0 : i32
    return %arg0, %c0_i32 : i32, i32
  }
}

</mosaic_0001>

<bundles_post_ra>
// kernel: forward.1
= control target key start
LH: loop header
LB: loop body
LE: loop exit
PB: predicated region body
PF: predicated region fallthrough
CT: control target
= control target key end

     0   :  { %s82_s0 = inlined_call_operand.vmem [shape: f32[8,256], index: 0, kind: input, shape index: {}]   ;;  %s83_s1 = inlined_call_operand.vmem [shape: f32[8,256], index: 1, kind: input, shape index: {}]   ;;  %s84_s2 = inlined_call_operand.vmem [shape: f32[8,256], index: 2, kind: output, shape index: {}]  }
   0x1   :  { %v11_v0 = vld [vmem:[%s82_s0] sm:$0xff]  ;;  %v12_v1 = vld [vmem:[%s82_s0 + $0x8] sm:$0xff] }
   0x2   :  { %v39_v2 = vmul.f32 -1.442695, %v11_v0  ;;  %v40_v3 = vmul.f32 -1.442695, %v12_v1  ;;  %v15_v8 = vmul.f32 2.0, %v11_v0  ;;  %v16_v9 = vmul.f32 2.0, %v12_v1 }
   0x3   :  { %v13_v11 = vld [vmem:[%s83_s1] sm:$0xff]  ;;  %v14_v14 = vld [vmem:[%s83_s1 + $0x8] sm:$0xff] }
   0x4   :  { %41 = vpow2.f32 %v39_v2 }
   0x5   :  { %43 = vpow2.f32 %v40_v3 }
  0x11   :  { %v42_v4 = vpop.eup %41 }
  0x12   :  { %v44_v5 = vpop.eup %43  ;;  %v23_v6 = vadd.f32 1.0, %v42_v4 }
  0x13   :  { %v24_v7 = vadd.f32 1.0, %v44_v5 }
  0x14   :  { %45 = vrcp.f32 %v23_v6 }
  0x15   :  { %47 = vrcp.f32 %v24_v7 }
  0x21   :  { %v46_v10 = vpop.eup %45 }
  0x22   :  { %v48_v12 = vpop.eup %47  ;;  %v29_v13 = vmul.f32 %v46_v10, %v15_v8 }
  0x23   :  { %v30_v15 = vmul.f32 %v48_v12, %v16_v9 }
  0x24   :  { %v31_v16 = vadd.f32 %v29_v13, %v13_v11 }
  0x25   :  { %v32_v17 = vadd.f32 %v30_v15, %v14_v14 }
  0x26   :  { %33 = vst [vmem:[%s84_s2] sm:$0xff] %v31_v16 }
  0x27   :  { %34 = vst [vmem:[%s84_s2 + $0x8] sm:$0xff] %v32_v17 }

</bundles_post_ra>
